<compile_context>
chip_gen: v5e
topology: v5e:2x2
jax: 0.10.0
libtpu: 0.0.40
codegen_flags: <defaults>
</compile_context>

<pallas_src>
import jax
import jax.numpy as jnp
from jax.experimental import pallas as pl
from jax.experimental.pallas import tpu as pltpu

IN_F = 6                        # real input features
IN_PAD = 8                      # 6 features + ones row (idx 6) + 1 zero row
OUT_F = 3                       # real output features
OUT_PAD = 8                     # sublane-aligned output slab written by kernel
LAYER_DIMS = [(6, 32), (32, 64), (64, 64), (64, 32), (32, 3)]
# Augmented (bias-folded + ones-unit) per-layer padded sizes, multiples of 8.
IN_PADS = [8, 40, 72, 72, 40]
OUT_PADS = [40, 72, 72, 40, 8]
ONES_ROWS = [6, 32, 64, 64, 32]  # input row carrying the constant 1 per layer


def _round_up(n, m):
    return ((n + m - 1) // m) * m


def _choose_tb(batch, tb_max=2048):
    """Batch tile: multiple of 256, minimizing padded MXU work; tie-break on an
    even grid length (v7x 2-TensorCore balance), then larger tiles."""
    b_ceil = _round_up(max(batch, 1), 256)
    if b_ceil <= 512:
        return b_ceil                       # tiny batch: one small tile
    candidates = range(256, min(tb_max, b_ceil) + 1, 256)

    def cost(tb):
        b_pad = _round_up(batch, tb)
        grid = b_pad // tb
        # padded samples + ~128-sample-equivalent per-grid-step overhead
        return (b_pad + 128 * grid, grid % 2, -tb)

    return min(candidates, key=cost)


def mlp_kernel(xt_ref, w1_ref, w2_ref, w3_ref, w4_ref, w5_ref, ot_ref):
    """Feature-major layout (batch on the 128-lane axis).

    xt_ref: (IN_PAD, TB) bf16 -- rows 0..5 = x^T, row 6 = ones (bias unit).
    w*_ref: (out_pad, in_pad) bf16 transposed augmented weights.
    ot_ref: (OUT_PAD, TB) f32 -- rows 0..2 are the real outputs.
    """
    h = xt_ref[...]                                       # bf16
    for w_ref in (w1_ref, w2_ref, w3_ref, w4_ref):
        h = jnp.dot(w_ref[...], h, preferred_element_type=jnp.float32)
        h = jnp.maximum(h, 0.0).astype(jnp.bfloat16)      # ReLU(1)=1 keeps ones unit
    h = jnp.dot(w5_ref[...], h, preferred_element_type=jnp.float32)
    ot_ref[...] = h.astype(ot_ref.dtype)


def pack_params(params):
    """params = [w1, b1, ..., w5, b5] with w_i: (in, out), b_i: (out,).

    Returns a tuple of 5 bf16 transposed augmented weights, shape
    (OUT_PADS[l], IN_PADS[l]).  Each bias sits in the row fed by the "ones"
    unit; the ones unit is re-emitted at column `fan_out` of each hidden layer
    so downstream biases keep working.
    """
    ws = [jnp.asarray(params[i], jnp.float32) for i in range(0, 10, 2)]
    bs = [jnp.reshape(jnp.asarray(params[i], jnp.float32), (-1,))
          for i in range(1, 10, 2)]
    packed = []
    for l, (w, b) in enumerate(zip(ws, bs)):
        fin, fout = w.shape
        a = jnp.zeros((IN_PADS[l], OUT_PADS[l]), jnp.float32)
        a = a.at[:fin, :fout].set(w)
        a = a.at[ONES_ROWS[l], :fout].set(b)
        if l < len(ws) - 1:
            a = a.at[ONES_ROWS[l], fout].set(1.0)   # re-emit the ones unit
        packed.append(a.T.astype(jnp.bfloat16))     # (out_pad, in_pad)
    return tuple(packed)


def mlp_forward(x, packed, *, tb_max=2048):
    """x: (B, 6) float32; packed = pack_params(params). Returns (B, 3) f32."""
    B = x.shape[0]
    assert x.shape[1] == IN_F, x.shape
    TB = _choose_tb(B, tb_max)
    B_pad = _round_up(B, TB)

    # Feature-major bf16 input slab built in a single pass:
    #   rows 0..5 = x^T, row 6 = ones (bias unit), row 7 = zero pad.
    # Padded batch columns produce garbage outputs that are sliced off below.
    xt = jnp.zeros((IN_PAD, B_pad), jnp.bfloat16)
    xt = xt.at[IN_F, :].set(1.0)
    xt = xt.at[:IN_F, :B].set(x.T.astype(jnp.bfloat16))

    flops = 2 * B_pad * sum(o * i for o, i in zip(OUT_PADS, IN_PADS))
    bytes_accessed = (2 * IN_PAD * B_pad          # bf16 input slab
                      + 4 * OUT_PAD * B_pad       # f32 output slab
                      + 2 * sum(int(w.size) for w in packed))

    w_specs = [pl.BlockSpec(w.shape, lambda i: (0, 0)) for w in packed]
    out_t = pl.pallas_call(
        mlp_kernel,
        out_shape=jax.ShapeDtypeStruct((OUT_PAD, B_pad), jnp.float32),
        grid_spec=pltpu.PrefetchScalarGridSpec(
            num_scalar_prefetch=0,
            grid=(B_pad // TB,),
            in_specs=[pl.BlockSpec((IN_PAD, TB), lambda i: (0, i))] + w_specs,
            out_specs=pl.BlockSpec((OUT_PAD, TB), lambda i: (0, i)),
        ),
        compiler_params=pltpu.CompilerParams(
            dimension_semantics=("parallel",)),
        cost_estimate=pl.CostEstimate(
            flops=flops, transcendentals=0, bytes_accessed=bytes_accessed),
    )(xt, *packed)

    return out_t[:OUT_F, :B].T


def init_linear_params(key, in_features, out_features):
    """Deterministic init mimicking torch.nn.Linear (uniform +- 1/sqrt(in))."""
    kw, kb = jax.random.split(key)
    bound = 1.0 / jnp.sqrt(jnp.float32(in_features))
    w = jax.random.uniform(kw, (in_features, out_features), jnp.float32,
                           minval=-bound, maxval=bound)
    b = jax.random.uniform(kb, (out_features,), jnp.float32,
                           minval=-bound, maxval=bound)
    return w, b


def build_params(key):
    keys = jax.random.split(key, len(LAYER_DIMS))
    params = []
    for k, (fin, fout) in zip(keys, LAYER_DIMS):
        w, b = init_linear_params(k, fin, fout)
        params.extend([w, b])
    return params


def reference_forward(x, params):
    h = x
    for i in range(0, len(params), 2):
        w, b = params[i], params[i + 1]
        h = h @ w + b[None, :]
        if i < len(params) - 2:
            h = jnp.maximum(h, 0.0)
    return h


if __name__ == "__main__":
    key = jax.random.PRNGKey(0)
    k_params, k_x1, k_x2 = jax.random.split(key, 3)

    params = build_params(k_params)
    packed = pack_params(params)
    fwd = jax.jit(mlp_forward)

    # Small primary check (batch=8), matching the module's (B, 6) input.
    # bf16 operands (f32 accumulation) -> relaxed tolerance vs the f32 ref.
    x = jax.random.normal(k_x1, (8, IN_F), jnp.float32)
    out = jax.block_until_ready(fwd(x, packed))
    ref = reference_forward(x, params)
    assert out.shape == (8, OUT_F), out.shape
    assert jnp.allclose(out, ref, atol=5e-2, rtol=5e-2), "mismatch (B=8)"

    # Ragged multi-tile batch to exercise the grid + padding path
    # (B=2100 -> TB=1152, grid=2, minimal padding, even split on v7x).
    x2 = jax.random.normal(k_x2, (2100, IN_F), jnp.float32)
    out2 = jax.block_until_ready(fwd(x2, packed))
    ref2 = reference_forward(x2, params)
    assert out2.shape == (2100, OUT_F), out2.shape
    assert jnp.allclose(out2, ref2, atol=5e-2, rtol=5e-2), "mismatch (B=2100)"

    print("KERNEL_OK")
</pallas_src>

<mosaic_0001>
module attributes {stable_mosaic.version = 11 : i64} {
  func.func @mlp_kernel(%arg0: i32, %arg1: memref<8x256xbf16, #tpu.memory_space<vmem>>, %arg2: memref<40x8xbf16, #tpu.memory_space<vmem>>, %arg3: memref<72x40xbf16, #tpu.memory_space<vmem>>, %arg4: memref<72x72xbf16, #tpu.memory_space<vmem>>, %arg5: memref<40x72xbf16, #tpu.memory_space<vmem>>, %arg6: memref<8x40xbf16, #tpu.memory_space<vmem>>, %arg7: memref<8x256xf32, #tpu.memory_space<vmem>>) attributes {dimension_semantics = [#tpu.dimension_semantics<parallel>], iteration_bounds = array<i64: 1>, scalar_prefetch = 0 : i64, scratch_operands = 0 : i64, tpu.core_type = #tpu.core_type<tc>, window_params = [{transform_indices = @transform_0, window_bounds = array<i64: 8, 256>}, {pipeline_mode = #tpu.pipeline_mode<synchronous>, transform_indices = @transform_1, window_bounds = array<i64: 40, 8>}, {pipeline_mode = #tpu.pipeline_mode<synchronous>, transform_indices = @transform_2, window_bounds = array<i64: 72, 40>}, {pipeline_mode = #tpu.pipeline_mode<synchronous>, transform_indices = @transform_3, window_bounds = array<i64: 72, 72>}, {pipeline_mode = #tpu.pipeline_mode<synchronous>, transform_indices = @transform_4, window_bounds = array<i64: 40, 72>}, {pipeline_mode = #tpu.pipeline_mode<synchronous>, transform_indices = @transform_5, window_bounds = array<i64: 8, 40>}, {transform_indices = @transform_6, window_bounds = array<i64: 8, 256>}]} {
    %c0 = arith.constant 0 : index
    %c0_0 = arith.constant 0 : index
    %0 = vector.load %arg1[%c0, %c0_0] : memref<8x256xbf16, #tpu.memory_space<vmem>>, vector<8x256xbf16>
    %c0_1 = arith.constant 0 : index
    %c0_2 = arith.constant 0 : index
    %1 = vector.load %arg2[%c0_1, %c0_2] : memref<40x8xbf16, #tpu.memory_space<vmem>>, vector<40x8xbf16>
    %cst = arith.constant dense<0.000000e+00> : vector<40x256xf32>
    %2 = tpu.matmul %1, %0, %cst {dimension_numbers = #tpu.dot_dimension_numbers<[1], [0], [0], [1], [0, 0, 1, 1], [], []>} : vector<40x8xbf16>, vector<8x256xbf16>, vector<40x256xf32> -> vector<40x256xf32>
    %cst_3 = arith.constant 0.000000e+00 : f32
    %3 = vector.broadcast %cst_3 : f32 to vector<40x256xf32>
    %4 = arith.maximumf %2, %3 : vector<40x256xf32>
    %5 = arith.truncf %4 : vector<40x256xf32> to vector<40x256xbf16>
    %c0_4 = arith.constant 0 : index
    %c0_5 = arith.constant 0 : index
    %6 = vector.load %arg3[%c0_4, %c0_5] : memref<72x40xbf16, #tpu.memory_space<vmem>>, vector<72x40xbf16>
    %cst_6 = arith.constant dense<0.000000e+00> : vector<72x256xf32>
    %7 = tpu.matmul %6, %5, %cst_6 {dimension_numbers = #tpu.dot_dimension_numbers<[1], [0], [0], [1], [0, 0, 1, 1], [], []>} : vector<72x40xbf16>, vector<40x256xbf16>, vector<72x256xf32> -> vector<72x256xf32>
    %cst_7 = arith.constant 0.000000e+00 : f32
    %8 = vector.broadcast %cst_7 : f32 to vector<72x256xf32>
    %9 = arith.maximumf %7, %8 : vector<72x256xf32>
    %10 = arith.truncf %9 : vector<72x256xf32> to vector<72x256xbf16>
    %c0_8 = arith.constant 0 : index
    %c0_9 = arith.constant 0 : index
    %11 = vector.load %arg4[%c0_8, %c0_9] : memref<72x72xbf16, #tpu.memory_space<vmem>>, vector<72x72xbf16>
    %cst_10 = arith.constant dense<0.000000e+00> : vector<72x256xf32>
    %12 = tpu.matmul %11, %10, %cst_10 {dimension_numbers = #tpu.dot_dimension_numbers<[1], [0], [0], [1], [0, 0, 1, 1], [], []>} : vector<72x72xbf16>, vector<72x256xbf16>, vector<72x256xf32> -> vector<72x256xf32>
    %cst_11 = arith.constant 0.000000e+00 : f32
    %13 = vector.broadcast %cst_11 : f32 to vector<72x256xf32>
    %14 = arith.maximumf %12, %13 : vector<72x256xf32>
    %15 = arith.truncf %14 : vector<72x256xf32> to vector<72x256xbf16>
    %c0_12 = arith.constant 0 : index
    %c0_13 = arith.constant 0 : index
    %16 = vector.load %arg5[%c0_12, %c0_13] : memref<40x72xbf16, #tpu.memory_space<vmem>>, vector<40x72xbf16>
    %cst_14 = arith.constant dense<0.000000e+00> : vector<40x256xf32>
    %17 = tpu.matmul %16, %15, %cst_14 {dimension_numbers = #tpu.dot_dimension_numbers<[1], [0], [0], [1], [0, 0, 1, 1], [], []>} : vector<40x72xbf16>, vector<72x256xbf16>, vector<40x256xf32> -> vector<40x256xf32>
    %cst_15 = arith.constant 0.000000e+00 : f32
    %18 = vector.broadcast %cst_15 : f32 to vector<40x256xf32>
    %19 = arith.maximumf %17, %18 : vector<40x256xf32>
    %20 = arith.truncf %19 : vector<40x256xf32> to vector<40x256xbf16>
    %c0_16 = arith.constant 0 : index
    %c0_17 = arith.constant 0 : index
    %21 = vector.load %arg6[%c0_16, %c0_17] : memref<8x40xbf16, #tpu.memory_space<vmem>>, vector<8x40xbf16>
    %cst_18 = arith.constant dense<0.000000e+00> : vector<8x256xf32>
    %22 = tpu.matmul %21, %20, %cst_18 {dimension_numbers = #tpu.dot_dimension_numbers<[1], [0], [0], [1], [0, 0, 1, 1], [], []>} : vector<8x40xbf16>, vector<40x256xbf16>, vector<8x256xf32> -> vector<8x256xf32>
    %c0_19 = arith.constant 0 : index
    %c0_20 = arith.constant 0 : index
    %23 = vector.load %arg7[%c0_19, %c0_20] : memref<8x256xf32, #tpu.memory_space<vmem>>, vector<8x256xf32>
    tpu.vector_store %arg7[%c0_19, %c0_20], %22 {strides = array<i32>} : memref<8x256xf32, #tpu.memory_space<vmem>>, vector<8x256xf32>,
    return
  }
  func.func @transform_0(%arg0: i32) -> (i32, i32) {
    %c0_i32 = arith.constant 0 : i32
    %c0_i32_0 = arith.constant 0 : i32
    return %c0_i32, %arg0 : i32, i32
  }
  func.func @transform_1(%arg0: i32) -> (i32, i32) {
    %c0_i32 = arith.constant 0 : i32
    %c0_i32_0 = arith.constant 0 : i32
    %c0_i32_1 = arith.constant 0 : i32
    return %c0_i32, %c0_i32_0 : i32, i32
  }
  func.func @transform_2(%arg0: i32) -> (i32, i32) {
    %c0_i32 = arith.constant 0 : i32
    %c0_i32_0 = arith.constant 0 : i32
    %c0_i32_1 = arith.constant 0 : i32
    return %c0_i32, %c0_i32_0 : i32, i32
  }
  func.func @transform_3(%arg0: i32) -> (i32, i32) {
    %c0_i32 = arith.constant 0 : i32
    %c0_i32_0 = arith.constant 0 : i32
    %c0_i32_1 = arith.constant 0 : i32
    return %c0_i32, %c0_i32_0 : i32, i32
  }
  func.func @transform_4(%arg0: i32) -> (i32, i32) {
    %c0_i32 = arith.constant 0 : i32
    %c0_i32_0 = arith.constant 0 : i32
    %c0_i32_1 = arith.constant 0 : i32
    return %c0_i32, %c0_i32_0 : i32, i32
  }
  func.func @transform_5(%arg0: i32) -> (i32, i32) {
    %c0_i32 = arith.constant 0 : i32
    %c0_i32_0 = arith.constant 0 : i32
    %c0_i32_1 = arith.constant 0 : i32
    return %c0_i32, %c0_i32_0 : i32, i32
  }
  func.func @transform_6(%arg0: i32) -> (i32, i32) {
    %c0_i32 = arith.constant 0 : i32
    %c0_i32_0 = arith.constant 0 : i32
    return %c0_i32, %arg0 : i32, i32
  }
}

</mosaic_0001>

<bundles_post_ra>
// kernel: mlp_forward.1
= control target key start
LH: loop header
LB: loop body
LE: loop exit
PB: predicated region body
PF: predicated region fallthrough
CT: control target
= control target key end

     0   :  { %vm58_vm0 = vcmask 1043456   ;;  %vm48_vm1 = vcmask 64512   ;;  %vm159_vm2 = vcmask 326656   ;;  %vm307_vm3 = vcmask 588800   ;;  %s787_s0 = inlined_call_operand.vmem [shape: bf16[8,256], index: 0, kind: input, shape index: {}]   ;;  %s788_s1 = inlined_call_operand.vmem [shape: bf16[40,8], index: 1, kind: input, shape index: {}]   ;;  %s789_s2 = inlined_call_operand.vmem [shape: bf16[72,40], index: 2, kind: input, shape index: {}]   ;;  %s790_s3 = inlined_call_operand.vmem [shape: bf16[72,72], index: 3, kind: input, shape index: {}]   ;;  %s791_s4 = inlined_call_operand.vmem [shape: bf16[40,72], index: 4, kind: input, shape index: {}]   ;;  %s792_s5 = inlined_call_operand.vmem [shape: bf16[8,40], index: 5, kind: input, shape index: {}]   ;;  %s793_s6 = inlined_call_operand.vmem [shape: f32[8,256], index: 6, kind: output, shape index: {}]  }
   0x1   :  { %v24_v0 = vld [vmem:[%s787_s0] sm:$0xff]  ;;  %v643_v8 = vld [vmem:[%s788_s1 + $0x8] sm:$0xff]  ;;  %v29_v9 = vld [vmem:[%s788_s1 + $0x10] sm:$0xf] }
   0x2   :  { %v44_v1 = vunpack.c.l.b16 %v24_v0  ;;  %v45_v2 = vunpack.c.h.b16 %v24_v0  ;;  %v642_v7 = vld [vmem:[%s788_s1] sm:$0xff]  ;;  %v39_v10 = vunpack.c.l.b16 %v29_v9  ;;  %v645_v43 = vld [vmem:[%s789_s2 + $0x8] sm:$0xff]  ;;  %v646_v44 = vld [vmem:[%s789_s2 + $0x10] sm:$0xff] }
   0x3   :  { %v644_v42 = vld [vmem:[%s789_s2] sm:$0xff]  ;;  %v647_v45 = vld [vmem:[%s789_s2 + $0x18] sm:$0xff] }
   0x4   :  { %v46_v3 = vpack.c.b16 %v44_v1, %v44_v1  ;;  %v47_v4 = vpack.c.b16 %v45_v2, %v45_v2  ;;  %v42_v11 = vpack.c.b16 %v39_v10, %v39_v10  ;;  %v135_v46 = vld [vmem:[%s789_s2 + $0x20] sm:$0xf] }
   0x5   :  { %v153_v47 = vunpack.c.l.b16 %v135_v46 }
   0x6   :  { %v60_v5 = vsel %vm58_vm0, %v46_v3, 0  ;;  %v63_v6 = vsel %vm58_vm0, %v47_v4, 0 }
   0x7   :  { %72 = vmatpush.bf16.msra.mxu0 %v60_v5  ;;  %95 = vmatpush.bf16.msra.mxu1 %v63_v6  ;;  %v158_v48 = vpack.c.b16 %v153_v47, %v153_v47 }
   0xa   :  { %568 = vmatmul.msk.bf16.vlgmr.msra.gmra.mxu0 %vm48_vm1, %v642_v7  ;;  %571 = vmatmul.msk.bf16.vlgmr.msra.gmra.mxu1 %vm48_vm1, %v642_v7 }
  0x1a   :  { %569 = vmatmul.msk.bf16.gmra.mxu0 %vm48_vm1, %v643_v8  ;;  %572 = vmatmul.msk.bf16.gmra.mxu1 %vm48_vm1, %v643_v8 }
  0x2a   :  { %570 = vmatmul.msk.bf16.gmra.mxu0 %vm48_vm1, %v42_v11  ;;  %573 = vmatmul.msk.bf16.gmra.mxu1 %vm48_vm1, %v42_v11 }
  0x87   :  { %v74_v12 = vpop.f32.mrf.mxu0  ;;  %v97_v13 = vpop.f32.mrf.mxu1 }
  0x88   :  { %v111_v38 = vmax.f32 %v74_v12, 0.0  ;;  %v112_v39 = vmax.f32 %v97_v13, 0.0 }
  0x8f   :  { %v76_v14 = vpop.f32.mrf.mxu0  ;;  %v99_v15 = vpop.f32.mrf.mxu1 }
  0x90   :  { %v113_v32 = vmax.f32 %v76_v14, 0.0  ;;  %v114_v33 = vmax.f32 %v99_v15, 0.0 }
  0x92   :  { %v121_v40 = vpack.c.bf16 %v113_v32, %v111_v38  ;;  %v122_v41 = vpack.c.bf16 %v114_v33, %v112_v39  ;;  %v651_v38 = vld [vmem:[%s790_s3 + $0x18] sm:$0xff]  ;;  %v283_v39 = vld [vmem:[%s790_s3 + $0x20] sm:$0xf] }
  0x97   :  { %v79_v16 = vpop.f32.mrf.mxu0  ;;  %v102_v17 = vpop.f32.mrf.mxu1 }
  0x98   :  { %v115_v30 = vmax.f32 %v79_v16, 0.0  ;;  %v116_v31 = vmax.f32 %v102_v17, 0.0 }
  0x9f   :  { %v81_v18 = vpop.f32.mrf.mxu0  ;;  %v104_v19 = vpop.f32.mrf.mxu1 }
  0xa0   :  { %v117_v26 = vmax.f32 %v81_v18, 0.0  ;;  %v118_v27 = vmax.f32 %v104_v19, 0.0 }
  0xa2   :  { %v123_v36 = vpack.c.bf16 %v117_v26, %v115_v30  ;;  %v124_v37 = vpack.c.bf16 %v118_v27, %v116_v31 }
  0xa7   :  { %v84_v20 = vpop.f32.mrf.mxu0  ;;  %v107_v21 = vpop.f32.mrf.mxu1 }
  0xa8   :  { %v119_v22 = vmax.f32 %v84_v20, 0.0  ;;  %v120_v23 = vmax.f32 %v107_v21, 0.0 }
  0xaa   :  { %v125_v24 = vpack.c.bf16 %v119_v22, %v119_v22  ;;  %v126_v25 = vpack.c.bf16 %v120_v23, %v120_v23 }
  0xac   :  { %v176_v28 = vsel %vm58_vm0, %v125_v24, 0  ;;  %v179_v29 = vsel %vm58_vm0, %v126_v25, 0 }
  0xad   :  { %186 = vmatpush.bf16.msra.mxu2 %v176_v28  ;;  %219 = vmatpush.bf16.msra.mxu3 %v179_v29 }
  0xaf   :  { %v86_v34 = vpop.f32.mrf.mxu0  ;;  %v109_v35 = vpop.f32.mrf.mxu1 }
  0xb0   :  { %v648_v35 = vld [vmem:[%s790_s3] sm:$0xff] }
  0xb1   :  { %187 = vmatpush.bf16.msra.mxu2 %v123_v36  ;;  %220 = vmatpush.bf16.msra.mxu3 %v124_v37  ;;  %v649_v36 = vld [vmem:[%s790_s3 + $0x8] sm:$0xff]  ;;  %v650_v37 = vld [vmem:[%s790_s3 + $0x10] sm:$0xff] }
  0xb5   :  { %188 = vmatpush.bf16.msra.mxu2 %v121_v40  ;;  %221 = vmatpush.bf16.msra.mxu3 %v122_v41  ;;  %v301_v40 = vunpack.c.l.b16 %v283_v39 }
  0xb7   :  { %v306_v41 = vpack.c.b16 %v301_v40, %v301_v40 }
  0xb8   :  { %590 = vmatmul.msk.bf16.vlgmr.msra.gmra.mxu2 %vm159_vm2, %v644_v42  ;;  %595 = vmatmul.msk.bf16.vlgmr.msra.gmra.mxu3 %vm159_vm2, %v644_v42 }
  0xc8   :  { %591 = vmatmul.msk.bf16.gmra.mxu2 %vm159_vm2, %v645_v43  ;;  %596 = vmatmul.msk.bf16.gmra.mxu3 %vm159_vm2, %v645_v43 }
  0xd8   :  { %592 = vmatmul.msk.bf16.gmra.mxu2 %vm159_vm2, %v646_v44  ;;  %597 = vmatmul.msk.bf16.gmra.mxu3 %vm159_vm2, %v646_v44 }
  0xe8   :  { %593 = vmatmul.msk.bf16.gmra.mxu2 %vm159_vm2, %v647_v45  ;;  %598 = vmatmul.msk.bf16.gmra.mxu3 %vm159_vm2, %v647_v45 }
  0xf8   :  { %594 = vmatmul.msk.bf16.gmra.mxu2 %vm159_vm2, %v158_v48  ;;  %599 = vmatmul.msk.bf16.gmra.mxu3 %vm159_vm2, %v158_v48 }
 0x13b   :  { %v190_v49 = vpop.f32.mrf.mxu2  ;;  %v223_v50 = vpop.f32.mrf.mxu3 }
 0x13c   :  { %v247_v53 = vmax.f32 %v190_v49, 0.0  ;;  %v248_v54 = vmax.f32 %v223_v50, 0.0 }
 0x143   :  { %v192_v51 = vpop.f32.mrf.mxu2  ;;  %v225_v52 = vpop.f32.mrf.mxu3 }
 0x144   :  { %v249_v55 = vmax.f32 %v192_v51, 0.0  ;;  %v250_v56 = vmax.f32 %v225_v52, 0.0 }
 0x146   :  { %v265_v57 = vpack.c.bf16 %v249_v55, %v247_v53  ;;  %v266_v58 = vpack.c.bf16 %v250_v56, %v248_v54 }
 0x14b   :  { %v195_v59 = vpop.f32.mrf.mxu2  ;;  %v228_v60 = vpop.f32.mrf.mxu3 }
 0x14c   :  { %v251_v31 = vmax.f32 %v195_v59, 0.0  ;;  %v252_v32 = vmax.f32 %v228_v60, 0.0 }
 0x153   :  { %v197_v61 = vpop.f32.mrf.mxu2  ;;  %v230_v62 = vpop.f32.mrf.mxu3 }
 0x154   :  { %v253_v27 = vmax.f32 %v197_v61, 0.0  ;;  %v254_v28 = vmax.f32 %v230_v62, 0.0 }
 0x156   :  { %v267_v33 = vpack.c.bf16 %v253_v27, %v251_v31  ;;  %v268_v34 = vpack.c.bf16 %v254_v28, %v252_v32  ;;  %v652_v28 = vld [vmem:[%s791_s4] sm:$0xff] }
 0x15b   :  { %v200_v63 = vpop.f32.mrf.mxu2  ;;  %v233_v0 = vpop.f32.mrf.mxu3 }
 0x15c   :  { %v255_v25 = vmax.f32 %v200_v63, 0.0  ;;  %v256_v26 = vmax.f32 %v233_v0, 0.0 }
 0x163   :  { %v202_v1 = vpop.f32.mrf.mxu2  ;;  %v235_v2 = vpop.f32.mrf.mxu3 }
 0x164   :  { %v257_v19 = vmax.f32 %v202_v1, 0.0  ;;  %v258_v20 = vmax.f32 %v235_v2, 0.0 }
 0x166   :  { %v269_v29 = vpack.c.bf16 %v257_v19, %v255_v25  ;;  %v270_v30 = vpack.c.bf16 %v258_v20, %v256_v26 }
 0x16b   :  { %v205_v3 = vpop.f32.mrf.mxu2  ;;  %v238_v4 = vpop.f32.mrf.mxu3 }
 0x16c   :  { %v259_v17 = vmax.f32 %v205_v3, 0.0  ;;  %v260_v18 = vmax.f32 %v238_v4, 0.0 }
 0x173   :  { %v207_v5 = vpop.f32.mrf.mxu2  ;;  %v240_v6 = vpop.f32.mrf.mxu3 }
 0x174   :  { %v261_v13 = vmax.f32 %v207_v5, 0.0  ;;  %v262_v14 = vmax.f32 %v240_v6, 0.0 }
 0x176   :  { %v271_v23 = vpack.c.bf16 %v261_v13, %v259_v17  ;;  %v272_v24 = vpack.c.bf16 %v262_v14, %v260_v18 }
 0x17b   :  { %v210_v7 = vpop.f32.mrf.mxu2  ;;  %v243_v8 = vpop.f32.mrf.mxu3 }
 0x17c   :  { %v263_v9 = vmax.f32 %v210_v7, 0.0  ;;  %v264_v10 = vmax.f32 %v243_v8, 0.0 }
 0x17e   :  { %v273_v11 = vpack.c.bf16 %v263_v9, %v263_v9  ;;  %v274_v12 = vpack.c.bf16 %v264_v10, %v264_v10 }
 0x180   :  { %v324_v15 = vsel %vm58_vm0, %v273_v11, 0  ;;  %v327_v16 = vsel %vm58_vm0, %v274_v12, 0 }
 0x181   :  { %332 = vmatpush.bf16.msrb.mxu0 %v324_v15  ;;  %365 = vmatpush.bf16.msrb.mxu1 %v327_v16 }
 0x183   :  { %v212_v21 = vpop.f32.mrf.mxu2  ;;  %v245_v22 = vpop.f32.mrf.mxu3 }
 0x185   :  { %333 = vmatpush.bf16.msrb.mxu0 %v271_v23  ;;  %366 = vmatpush.bf16.msrb.mxu1 %v272_v24 }
 0x189   :  { %334 = vmatpush.bf16.msrb.mxu0 %v269_v29  ;;  %367 = vmatpush.bf16.msrb.mxu1 %v270_v30  ;;  %v653_v29 = vld [vmem:[%s791_s4 + $0x8] sm:$0xff]  ;;  %v427_v30 = vld [vmem:[%s791_s4 + $0x10] sm:$0xf] }
 0x18a   :  { %v437_v31 = vunpack.c.l.b16 %v427_v30 }
 0x18c   :  { %v440_v32 = vpack.c.b16 %v437_v31, %v437_v31 }
 0x18d   :  { %335 = vmatpush.bf16.msrb.mxu0 %v267_v33  ;;  %368 = vmatpush.bf16.msrb.mxu1 %v268_v34 }
 0x191   :  { %336 = vmatpush.bf16.msrb.mxu0 %v265_v57  ;;  %369 = vmatpush.bf16.msrb.mxu1 %v266_v58 }
 0x194   :  { %616 = vmatmul.msk.bf16.vlgmr.msrb.gmra.mxu0 %vm307_vm3, %v648_v35  ;;  %621 = vmatmul.msk.bf16.vlgmr.msrb.gmra.mxu1 %vm307_vm3, %v648_v35 }
 0x1a4   :  { %617 = vmatmul.msk.bf16.gmra.mxu0 %vm307_vm3, %v649_v36  ;;  %622 = vmatmul.msk.bf16.gmra.mxu1 %vm307_vm3, %v649_v36 }
 0x1b4   :  { %618 = vmatmul.msk.bf16.gmra.mxu0 %vm307_vm3, %v650_v37  ;;  %623 = vmatmul.msk.bf16.gmra.mxu1 %vm307_vm3, %v650_v37 }
 0x1c4   :  { %619 = vmatmul.msk.bf16.gmra.mxu0 %vm307_vm3, %v651_v38  ;;  %624 = vmatmul.msk.bf16.gmra.mxu1 %vm307_vm3, %v651_v38 }
 0x1d4   :  { %620 = vmatmul.msk.bf16.gmra.mxu0 %vm307_vm3, %v306_v41  ;;  %625 = vmatmul.msk.bf16.gmra.mxu1 %vm307_vm3, %v306_v41 }
 0x211   :  { %v338_v42 = vpop.f32.mrf.mxu0  ;;  %v371_v43 = vpop.f32.mrf.mxu1 }
 0x212   :  { %v395_v46 = vmax.f32 %v338_v42, 0.0  ;;  %v396_v47 = vmax.f32 %v371_v43, 0.0 }
 0x219   :  { %v340_v44 = vpop.f32.mrf.mxu0  ;;  %v373_v45 = vpop.f32.mrf.mxu1 }
 0x21a   :  { %v397_v48 = vmax.f32 %v340_v44, 0.0  ;;  %v398_v49 = vmax.f32 %v373_v45, 0.0 }
 0x21c   :  { %v413_v50 = vpack.c.bf16 %v397_v48, %v395_v46  ;;  %v414_v51 = vpack.c.bf16 %v398_v49, %v396_v47 }
 0x221   :  { %v343_v52 = vpop.f32.mrf.mxu0  ;;  %v376_v53 = vpop.f32.mrf.mxu1 }
 0x222   :  { %v399_v24 = vmax.f32 %v343_v52, 0.0  ;;  %v400_v25 = vmax.f32 %v376_v53, 0.0 }
 0x229   :  { %v345_v54 = vpop.f32.mrf.mxu0  ;;  %v378_v55 = vpop.f32.mrf.mxu1 }
 0x22a   :  { %v401_v20 = vmax.f32 %v345_v54, 0.0  ;;  %v402_v21 = vmax.f32 %v378_v55, 0.0 }
 0x22c   :  { %v415_v26 = vpack.c.bf16 %v401_v20, %v399_v24  ;;  %v416_v27 = vpack.c.bf16 %v402_v21, %v400_v25 }
 0x231   :  { %v348_v56 = vpop.f32.mrf.mxu0  ;;  %v381_v57 = vpop.f32.mrf.mxu1 }
 0x232   :  { %v403_v18 = vmax.f32 %v348_v56, 0.0  ;;  %v404_v19 = vmax.f32 %v381_v57, 0.0 }
 0x239   :  { %v350_v58 = vpop.f32.mrf.mxu0  ;;  %v383_v59 = vpop.f32.mrf.mxu1 }
 0x23a   :  { %v405_v12 = vmax.f32 %v350_v58, 0.0  ;;  %v406_v13 = vmax.f32 %v383_v59, 0.0 }
 0x23c   :  { %v417_v22 = vpack.c.bf16 %v405_v12, %v403_v18  ;;  %v418_v23 = vpack.c.bf16 %v406_v13, %v404_v19 }
 0x241   :  { %v353_v60 = vpop.f32.mrf.mxu0  ;;  %v386_v61 = vpop.f32.mrf.mxu1 }
 0x242   :  { %v407_v10 = vmax.f32 %v353_v60, 0.0  ;;  %v408_v11 = vmax.f32 %v386_v61, 0.0 }
 0x249   :  { %v355_v62 = vpop.f32.mrf.mxu0  ;;  %v388_v63 = vpop.f32.mrf.mxu1 }
 0x24a   :  { %v409_v6 = vmax.f32 %v355_v62, 0.0  ;;  %v410_v7 = vmax.f32 %v388_v63, 0.0  ;;  %v518_v63 = vld [vmem:[%s792_s5] sm:$0xf] }
 0x24c   :  { %v419_v16 = vpack.c.bf16 %v409_v6, %v407_v10  ;;  %v420_v17 = vpack.c.bf16 %v410_v7, %v408_v11 }
 0x251   :  { %v358_v0 = vpop.f32.mrf.mxu0  ;;  %v391_v1 = vpop.f32.mrf.mxu1 }
 0x252   :  { %v411_v2 = vmax.f32 %v358_v0, 0.0  ;;  %v412_v3 = vmax.f32 %v391_v1, 0.0 }
 0x254   :  { %v421_v4 = vpack.c.bf16 %v411_v2, %v411_v2  ;;  %v422_v5 = vpack.c.bf16 %v412_v3, %v412_v3 }
 0x256   :  { %v451_v8 = vsel %vm58_vm0, %v421_v4, 0  ;;  %v454_v9 = vsel %vm58_vm0, %v422_v5, 0 }
 0x257   :  { %459 = vmatpush.bf16.msrb.mxu2 %v451_v8  ;;  %482 = vmatpush.bf16.msrb.mxu3 %v454_v9 }
 0x259   :  { %v360_v14 = vpop.f32.mrf.mxu0  ;;  %v393_v15 = vpop.f32.mrf.mxu1 }
 0x25b   :  { %460 = vmatpush.bf16.msrb.mxu2 %v419_v16  ;;  %483 = vmatpush.bf16.msrb.mxu3 %v420_v17 }
 0x25f   :  { %461 = vmatpush.bf16.msrb.mxu2 %v417_v22  ;;  %484 = vmatpush.bf16.msrb.mxu3 %v418_v23 }
 0x263   :  { %462 = vmatpush.bf16.msrb.mxu2 %v415_v26  ;;  %485 = vmatpush.bf16.msrb.mxu3 %v416_v27 }
 0x267   :  { %463 = vmatpush.bf16.msrb.mxu2 %v413_v50  ;;  %486 = vmatpush.bf16.msrb.mxu3 %v414_v51 }
 0x26a   :  { %634 = vmatmul.msk.bf16.vlgmr.msrb.gmra.mxu2 %vm307_vm3, %v652_v28  ;;  %637 = vmatmul.msk.bf16.vlgmr.msrb.gmra.mxu3 %vm307_vm3, %v652_v28 }
 0x27a   :  { %635 = vmatmul.msk.bf16.gmra.mxu2 %vm307_vm3, %v653_v29  ;;  %638 = vmatmul.msk.bf16.gmra.mxu3 %vm307_vm3, %v653_v29 }
 0x28a   :  { %636 = vmatmul.msk.bf16.gmra.mxu2 %vm307_vm3, %v440_v32  ;;  %639 = vmatmul.msk.bf16.gmra.mxu3 %vm307_vm3, %v440_v32 }
 0x2ed   :  { %v465_v33 = vpop.f32.mrf.mxu2  ;;  %v488_v34 = vpop.f32.mrf.mxu3 }
 0x2ee   :  { %v502_v59 = vmax.f32 %v465_v33, 0.0  ;;  %v503_v60 = vmax.f32 %v488_v34, 0.0 }
 0x2f5   :  { %v467_v35 = vpop.f32.mrf.mxu2  ;;  %v490_v36 = vpop.f32.mrf.mxu3 }
 0x2f6   :  { %v504_v53 = vmax.f32 %v467_v35, 0.0  ;;  %v505_v54 = vmax.f32 %v490_v36, 0.0 }
 0x2f8   :  { %v512_v61 = vpack.c.bf16 %v504_v53, %v502_v59  ;;  %v513_v62 = vpack.c.bf16 %v505_v54, %v503_v60 }
 0x2fd   :  { %v470_v37 = vpop.f32.mrf.mxu2  ;;  %v493_v38 = vpop.f32.mrf.mxu3 }
 0x2fe   :  { %v506_v51 = vmax.f32 %v470_v37, 0.0  ;;  %v507_v52 = vmax.f32 %v493_v38, 0.0 }
 0x305   :  { %v472_v39 = vpop.f32.mrf.mxu2  ;;  %v495_v40 = vpop.f32.mrf.mxu3 }
 0x306   :  { %v508_v47 = vmax.f32 %v472_v39, 0.0  ;;  %v509_v48 = vmax.f32 %v495_v40, 0.0 }
 0x308   :  { %v514_v55 = vpack.c.bf16 %v508_v47, %v506_v51  ;;  %v515_v56 = vpack.c.bf16 %v509_v48, %v507_v52 }
 0x30d   :  { %v475_v41 = vpop.f32.mrf.mxu2  ;;  %v498_v42 = vpop.f32.mrf.mxu3 }
 0x30e   :  { %v510_v43 = vmax.f32 %v475_v41, 0.0  ;;  %v511_v44 = vmax.f32 %v498_v42, 0.0 }
 0x310   :  { %v516_v45 = vpack.c.bf16 %v510_v43, %v510_v43  ;;  %v517_v46 = vpack.c.bf16 %v511_v44, %v511_v44 }
 0x312   :  { %v523_v49 = vsel %vm58_vm0, %v516_v45, 0  ;;  %v526_v50 = vsel %vm58_vm0, %v517_v46, 0 }
 0x313   :  { %533 = vmatpush.bf16.msra.mxu0 %v523_v49  ;;  %546 = vmatpush.bf16.msra.mxu1 %v526_v50 }
 0x315   :  { %v477_v57 = vpop.f32.mrf.mxu2  ;;  %v500_v58 = vpop.f32.mrf.mxu3 }
 0x317   :  { %534 = vmatpush.bf16.msra.mxu0 %v514_v55  ;;  %547 = vmatpush.bf16.msra.mxu1 %v515_v56 }
 0x31b   :  { %535 = vmatpush.bf16.msra.mxu0 %v512_v61  ;;  %548 = vmatpush.bf16.msra.mxu1 %v513_v62 }
 0x31e   :  { %640 = vmatmul.msk.bf16.vlgmr.msra.gmra.mxu0 %vm159_vm2, %v518_v63  ;;  %641 = vmatmul.msk.bf16.vlgmr.msra.gmra.mxu1 %vm159_vm2, %v518_v63 }
 0x39b   :  { %v537_v0 = vpop.f32.mrf.mxu0  ;;  %v550_v1 = vpop.f32.mrf.mxu1 }
 0x39c   :  { %554 = vst [vmem:[%s793_s6] sm:$0xff] %v537_v0 }
 0x39d   :  { %555 = vst [vmem:[%s793_s6 + $0x8] sm:$0xff] %v550_v1 }
 0x3a3   :  { %v539_v2 = vpop.f32.mrf.mxu0  ;;  %v552_v3 = vpop.f32.mrf.mxu1 }

</bundles_post_ra>
